<compile_context>
chip_gen: v5e
topology: v5e:2x2
jax: 0.10.0
libtpu: 0.0.40
codegen_flags: <defaults>
</compile_context>

<pallas_src>
import jax
import jax.numpy as jnp
from jax.experimental import pallas as pl
from jax.experimental.pallas import tpu as pltpu

_LANES = 128
_MAX_TILE_ROWS = 1 << 18                    # bounds a single DMA / output block
_FALLBACK_VMEM_BYTES = 64 * 1024 * 1024     # v7x per-TensorCore VMEM (smallest gen)


def _physical_vmem_bytes() -> int:
    """Per-core VMEM capacity; conservative fallback if the query fails."""
    try:
        info = pltpu.get_tpu_info()
        for name in ("vmem_capacity_bytes", "vmem_size_bytes", "vmem_bytes"):
            cap = getattr(info, name, None)
            if cap:
                return int(cap)
    except Exception:
        pass
    return _FALLBACK_VMEM_BYTES


def _min_tile_rows(out_dtype) -> int:
    # Output block is (rows/128, 128); keep its sublane count a multiple of the
    # native packed tile (8 for 32-bit, 16 for bf16, 32 for int8/fp8) so every
    # store is an unmasked native-tile vst (matters most on v5e: 1 vst slot).
    itemsize = jnp.dtype(out_dtype).itemsize
    sublanes = 8 * max(1, 4 // max(1, itemsize))
    return _LANES * sublanes                 # 1024 (f32) / 2048 (bf16) / 4096 (int8)


def _dot_small_kernel(xi_ref, xj_ref, o_ref):
    # Tiny problems: whole arrays in one VMEM block, f32 accumulation.
    prod = xi_ref[...].astype(jnp.float32) * xj_ref[...].astype(jnp.float32)
    o_ref[...] = jnp.sum(prod, axis=-1, keepdims=True).astype(o_ref.dtype)


def _dot_tiled_kernel(xi_ref, xj_ref, o_ref):
    # xi_ref / xj_ref: (tn, D) row tile;  o_ref: (tn // 128, 128) lane-dense.
    r, lanes = o_ref.shape
    d = xi_ref.shape[-1]
    prod = xi_ref[...].astype(jnp.float32) * xj_ref[...].astype(jnp.float32)
    # Layout-preserving split of the row axis (tn = r*128, both multiples of
    # the sublane tile), then a lane-axis reduction; the (r, 128) result is
    # stored as a full lane-dense slab -> every store/DMA is unmasked.
    prod3 = prod.reshape(r, lanes, d)
    o_ref[...] = jnp.sum(prod3, axis=-1).astype(o_ref.dtype)


def _choose_row_tile(n_rows, d, in_itemsize, min_tile, vmem_limit_bytes):
    """Rows per grid step, a multiple of min_tile, sized from the *padded*
    VMEM footprint: 2 inputs x 2 pipeline buffers (lane-padded, input dtype)
    plus f32 upcast/product temporaries when the input dtype is sub-32-bit."""
    d_padded = pl.cdiv(d, _LANES) * _LANES
    per_row = 2 * 2 * d_padded * in_itemsize          # double-buffered input blocks
    if in_itemsize < 4:
        per_row += 2 * d_padded * 4                   # f32 upcast + product temps
    blocks_budget = (vmem_limit_bytes * 4) // 5       # ~20% slack: out blocks, scratch
    budget = (blocks_budget // per_row) // min_tile * min_tile
    budget = max(min_tile, min(budget, _MAX_TILE_ROWS))
    whole = (n_rows // min_tile) * min_tile
    quarter = (n_rows // 4) // min_tile * min_tile    # >=4 steps -> >=2 per v7x core
    tn = budget
    if whole >= min_tile:
        tn = min(tn, whole)
    if quarter >= min_tile:
        tn = min(tn, quarter)
    return max(min_tile, tn)


def dot_predictor(x_i: jax.Array, x_j: jax.Array) -> jax.Array:
    """Pallas equivalent of DotPredictor.forward: sum(x_i * x_j, axis=-1)."""
    assert x_i.shape == x_j.shape, "x_i and x_j must have identical shapes"
    *lead, d = x_i.shape
    lead = tuple(lead)
    n = 1
    for s in lead:
        n *= s
    out_dtype = x_i.dtype
    if n == 0 or d == 0:
        return jnp.zeros(lead, dtype=out_dtype)

    xi2 = x_i.reshape(n, d)          # free, row-major
    xj2 = x_j.reshape(n, d)
    in_itemsize = jnp.dtype(x_i.dtype).itemsize
    out_itemsize = jnp.dtype(out_dtype).itemsize
    cost = pl.CostEstimate(
        flops=2 * n * d,
        transcendentals=0,
        bytes_accessed=2 * n * d * in_itemsize + n * out_itemsize,
    )

    min_tile = _min_tile_rows(out_dtype)
    if n < min_tile:
        # Tiny problem: single full-array block, no tiling constraints.
        out = pl.pallas_call(
            _dot_small_kernel,
            out_shape=jax.ShapeDtypeStruct((n, 1), out_dtype),
            cost_estimate=cost,
        )(xi2, xj2)
        return out[:, 0].reshape(lead)

    physical_vmem = _physical_vmem_bytes()
    vmem_limit = (physical_vmem * 3) // 4              # 48 MiB v7x, 96 MiB v5e/v6e
    tn = _choose_row_tile(n, d, in_itemsize, min_tile, vmem_limit)
    grid = pl.cdiv(n, tn)                              # ragged tail masked by Pallas
    r = tn // _LANES                                   # output sublane rows per step

    out = pl.pallas_call(
        _dot_tiled_kernel,
        out_shape=jax.ShapeDtypeStruct((grid * r, _LANES), out_dtype),
        grid_spec=pltpu.PrefetchScalarGridSpec(
            num_scalar_prefetch=0,
            grid=(grid,),
            in_specs=[
                pl.BlockSpec((tn, d), lambda i: (i, 0)),
                pl.BlockSpec((tn, d), lambda i: (i, 0)),
            ],
            out_specs=pl.BlockSpec((r, _LANES), lambda i: (i, 0)),
        ),
        compiler_params=pltpu.CompilerParams(
            dimension_semantics=("parallel",),
            vmem_limit_bytes=int(vmem_limit),
        ),
        cost_estimate=cost,
    )(xi2, xj2)

    # Lane-dense (grid*r, 128) slab -> flat [grid*tn] -> valid [N] rows.  Rows
    # beyond N were computed from Pallas' masked edge-block garbage and are
    # discarded here; never reduce over them.
    return out.reshape(-1)[:n].reshape(lead)


if __name__ == "__main__":
    # DotPredictor has no parameters (__init__ / reset_parameters are no-ops).
    key = jax.random.PRNGKey(0)
    k1, k2, k3, k4, k5, k6 = jax.random.split(key, 6)

    # Small case (typical link-prediction use: [num_edges, hidden]).
    N, D = 256, 32
    x_i = jax.random.normal(k1, (N, D), dtype=jnp.float32)
    x_j = jax.random.normal(k2, (N, D), dtype=jnp.float32)
    out = jax.block_until_ready(dot_predictor(x_i, x_j))
    ref = jnp.sum(x_i * x_j, axis=-1)
    assert out.shape == (N,)
    assert jnp.allclose(out, ref, atol=1e-5, rtol=1e-5)

    # Larger, non-divisible f32 case exercising the tiled lane-dense path
    # (grid > 1, ragged final block).
    N2 = 2500
    y_i = jax.random.normal(k3, (N2, D), dtype=jnp.float32)
    y_j = jax.random.normal(k4, (N2, D), dtype=jnp.float32)
    out2 = jax.block_until_ready(dot_predictor(y_i, y_j))
    ref2 = jnp.sum(y_i * y_j, axis=-1)
    assert out2.shape == (N2,)
    assert jnp.allclose(out2, ref2, atol=1e-4, rtol=1e-4)

    # bf16 case exercising the dtype-dependent (16,128) output tile alignment.
    N3 = 3000
    z_i = jax.random.normal(k5, (N3, D), dtype=jnp.float32).astype(jnp.bfloat16)
    z_j = jax.random.normal(k6, (N3, D), dtype=jnp.float32).astype(jnp.bfloat16)
    out3 = jax.block_until_ready(dot_predictor(z_i, z_j))
    ref3 = jnp.sum(z_i.astype(jnp.float32) * z_j.astype(jnp.float32),
                   axis=-1).astype(jnp.bfloat16)
    assert out3.shape == (N3,)
    assert jnp.allclose(out3.astype(jnp.float32), ref3.astype(jnp.float32),
                        atol=1e-1, rtol=5e-2)

    print("KERNEL_OK")
</pallas_src>

<mosaic_0001>
module attributes {stable_mosaic.version = 11 : i64} {
  func.func @_dot_small_kernel(%arg0: memref<256x32xf32, #tpu.memory_space<vmem>>, %arg1: memref<256x32xf32, #tpu.memory_space<vmem>>, %arg2: memref<256x1xf32, #tpu.memory_space<vmem>>) attributes {dimension_semantics = [], scalar_prefetch = 0 : i64, scratch_operands = 0 : i64, tpu.core_type = #tpu.core_type<tc>} {
    %c0 = arith.constant 0 : index
    %c0_0 = arith.constant 0 : index
    %0 = vector.load %arg0[%c0, %c0_0] : memref<256x32xf32, #tpu.memory_space<vmem>>, vector<256x32xf32>
    %c0_1 = arith.constant 0 : index
    %c0_2 = arith.constant 0 : index
    %1 = vector.load %arg1[%c0_1, %c0_2] : memref<256x32xf32, #tpu.memory_space<vmem>>, vector<256x32xf32>
    %2 = arith.mulf %0, %1 : vector<256x32xf32>
    %cst = arith.constant dense<0.000000e+00> : vector<256xf32>
    %3 = vector.multi_reduction <add>, %2, %cst [1] : vector<256x32xf32> to vector<256xf32>
    %4 = vector.shape_cast %3 : vector<256xf32> to vector<256x1xf32>
    %c0_3 = arith.constant 0 : index
    %c0_4 = arith.constant 0 : index
    %5 = vector.load %arg2[%c0_3, %c0_4] : memref<256x1xf32, #tpu.memory_space<vmem>>, vector<256x1xf32>
    tpu.vector_store %arg2[%c0_3, %c0_4], %4 {strides = array<i32>} : memref<256x1xf32, #tpu.memory_space<vmem>>, vector<256x1xf32>,
    return
  }
}

</mosaic_0001>

<bundles_post_ra>
// kernel: tpu_custom_call.1
= control target key start
LH: loop header
LB: loop body
LE: loop exit
PB: predicated region body
PF: predicated region fallthrough
CT: control target
= control target key end

     0   :  { %vm107_vm0 = vcmask 261120   ;;  %vm204_vm1 = vcmask 7168   ;;  %s614_s0 = inlined_call_operand.vmem [shape: f32[256,32], index: 0, kind: input, shape index: {}]   ;;  %s615_s1 = inlined_call_operand.vmem [shape: f32[256,32], index: 1, kind: input, shape index: {}]   ;;  %s616_s2 = inlined_call_operand.vmem [shape: f32[256,1], index: 2, kind: output, shape index: {}]  }
   0x1   :  { %v13_v0 = vld [vmem:[%s614_s0 + $0x10] sm:$0xff]  ;;  %v11_v2 = vld [vmem:[%s614_s0] sm:$0xff]  ;;  %v14_v9 = vld [vmem:[%s614_s0 + $0x18] sm:$0xff] }
   0x2   :  { %v45_v1 = vld [vmem:[%s615_s1 + $0x10] sm:$0xff]  ;;  %v43_v4 = vld [vmem:[%s615_s1] sm:$0xff]  ;;  %v46_v10 = vld [vmem:[%s615_s1 + $0x18] sm:$0xff] }
   0x3   :  { %v77_v3 = vmul.f32 %v45_v1, %v13_v0  ;;  %v15_v5 = vld [vmem:[%s614_s0 + $0x20] sm:$0xff]  ;;  %v75_v7 = vmul.f32 %v43_v4, %v11_v2  ;;  %v12_v11 = vld [vmem:[%s614_s0 + $0x8] sm:$0xff]  ;;  %v78_v18 = vmul.f32 %v46_v10, %v14_v9  ;;  %v18_v24 = vld [vmem:[%s614_s0 + $0x38] sm:$0xff] }
   0x4   :  { %v47_v6 = vld [vmem:[%s615_s1 + $0x20] sm:$0xff]  ;;  %v44_v13 = vld [vmem:[%s615_s1 + $0x8] sm:$0xff]  ;;  %v50_v25 = vld [vmem:[%s615_s1 + $0x38] sm:$0xff] }
   0x5   :  { %v79_v8 = vmul.f32 %v47_v6, %v15_v5  ;;  %v114_v12 = vsel %vm107_vm0, %v77_v3, 0.0  ;;  %v16_v14 = vld [vmem:[%s614_s0 + $0x28] sm:$0xff]  ;;  %v108_v16 = vsel %vm107_vm0, %v75_v7, 0.0  ;;  %v76_v19 = vmul.f32 %v44_v13, %v12_v11  ;;  %v17_v26 = vld [vmem:[%s614_s0 + $0x30] sm:$0xff]  ;;  %v19_v28 = vld [vmem:[%s614_s0 + $0x40] sm:$0xff] }
   0x6   :  { %v48_v15 = vld [vmem:[%s615_s1 + $0x28] sm:$0xff]  ;;  %115 = vadd.xlane.f32.xlu1 %v114_v12  ;;  %109 = vadd.xlane.f32.xlu0 %v108_v16  ;;  %v117_v21 = vsel %vm107_vm0, %v78_v18, 0.0  ;;  %v49_v27 = vld [vmem:[%s615_s1 + $0x30] sm:$0xff]  ;;  %v51_v29 = vld [vmem:[%s615_s1 + $0x40] sm:$0xff]  ;;  %v82_v30 = vmul.f32 %v50_v25, %v18_v24 }
   0x7   :  { %v120_v17 = vsel %vm107_vm0, %v79_v8, 0.0  ;;  %v80_v20 = vmul.f32 %v48_v15, %v16_v14  ;;  %v111_v22 = vsel %vm107_vm0, %v76_v19, 0.0  ;;  %v81_v31 = vmul.f32 %v49_v27, %v17_v26  ;;  %v21_v36 = vld [vmem:[%s614_s0 + $0x50] sm:$0xff]  ;;  %v20_v38 = vld [vmem:[%s614_s0 + $0x48] sm:$0xff]  ;;  %v22_v40 = vld [vmem:[%s614_s0 + $0x58] sm:$0xff] }
   0x8   :  { %121 = vadd.xlane.f32.xlu2 %v120_v17  ;;  %v83_v32 = vmul.f32 %v51_v29, %v19_v28  ;;  %v129_v33 = vsel %vm107_vm0, %v82_v30, 0.0  ;;  %v53_v37 = vld [vmem:[%s615_s1 + $0x50] sm:$0xff]  ;;  %v52_v39 = vld [vmem:[%s615_s1 + $0x48] sm:$0xff]  ;;  %v54_v41 = vld [vmem:[%s615_s1 + $0x58] sm:$0xff] }
   0x9   :  { %v123_v23 = vsel %vm107_vm0, %v80_v20, 0.0  ;;  %v126_v34 = vsel %vm107_vm0, %v81_v31, 0.0  ;;  %v85_v42 = vmul.f32 %v53_v37, %v21_v36  ;;  %v84_v43 = vmul.f32 %v52_v39, %v20_v38  ;;  %v24_v48 = vld [vmem:[%s614_s0 + $0x68] sm:$0xff]  ;;  %v23_v50 = vld [vmem:[%s614_s0 + $0x60] sm:$0xff]  ;;  %v25_v52 = vld [vmem:[%s614_s0 + $0x70] sm:$0xff] }
   0xa   :  { %v132_v35 = vsel %vm107_vm0, %v83_v32, 0.0  ;;  %v86_v44 = vmul.f32 %v54_v41, %v22_v40  ;;  %v56_v49 = vld [vmem:[%s615_s1 + $0x68] sm:$0xff]  ;;  %v55_v51 = vld [vmem:[%s615_s1 + $0x60] sm:$0xff]  ;;  %v57_v53 = vld [vmem:[%s615_s1 + $0x70] sm:$0xff] }
   0xb   :  { %v138_v45 = vsel %vm107_vm0, %v85_v42, 0.0  ;;  %v135_v46 = vsel %vm107_vm0, %v84_v43, 0.0  ;;  %v88_v54 = vmul.f32 %v56_v49, %v24_v48  ;;  %v36_v55 = vld [vmem:[%s614_s0 + $0xc8] sm:$0xff]  ;;  %v87_v56 = vmul.f32 %v55_v51, %v23_v50  ;;  %v35_v62 = vld [vmem:[%s614_s0 + $0xc0] sm:$0xff]  ;;  %v26_v4 = vld [vmem:[%s614_s0 + $0x78] sm:$0xff] }
   0xc   :  { %v141_v47 = vsel %vm107_vm0, %v86_v44, 0.0  ;;  %v89_v57 = vmul.f32 %v57_v53, %v25_v52  ;;  %v68_v58 = vld [vmem:[%s615_s1 + $0xc8] sm:$0xff]  ;;  %v67_v63 = vld [vmem:[%s615_s1 + $0xc0] sm:$0xff]  ;;  %v58_v6 = vld [vmem:[%s615_s1 + $0x78] sm:$0xff] }
   0xd   :  { %v100_v59 = vmul.f32 %v68_v58, %v36_v55  ;;  %v147_v60 = vsel %vm107_vm0, %v88_v54, 0.0  ;;  %v144_v0 = vsel %vm107_vm0, %v87_v56, 0.0  ;;  %v27_v2 = vld [vmem:[%s614_s0 + $0x80] sm:$0xff]  ;;  %v99_v5 = vmul.f32 %v67_v63, %v35_v62  ;;  %v28_v7 = vld [vmem:[%s614_s0 + $0x88] sm:$0xff]  ;;  %v37_v11 = vld [vmem:[%s614_s0 + $0xd0] sm:$0xff] }
   0xe   :  { %118 = vadd.xlane.f32.xlu1 %v117_v21  ;;  %112 = vadd.xlane.f32.xlu0 %v111_v22  ;;  %v150_v1 = vsel %vm107_vm0, %v89_v57, 0.0  ;;  %v59_v3 = vld [vmem:[%s615_s1 + $0x80] sm:$0xff]  ;;  %v60_v8 = vld [vmem:[%s615_s1 + $0x88] sm:$0xff]  ;;  %v69_v12 = vld [vmem:[%s615_s1 + $0xd0] sm:$0xff]  ;;  %v90_v14 = vmul.f32 %v58_v6, %v26_v4 }
   0xf   :  { %v366_v61 = vsel %vm107_vm0, %v100_v59, 0.0  ;;  %v395_v9 = vsel %vm107_vm0, %v99_v5, 0.0  ;;  %v91_v10 = vmul.f32 %v59_v3, %v27_v2  ;;  %v39_v13 = vld [vmem:[%s614_s0 + $0xe0] sm:$0xff]  ;;  %v92_v15 = vmul.f32 %v60_v8, %v28_v7  ;;  %v38_v22 = vld [vmem:[%s614_s0 + $0xd8] sm:$0xff]  ;;  %v29_v28 = vld [vmem:[%s614_s0 + $0x90] sm:$0xff] }
  0x10   :  { %124 = vadd.xlane.f32.xlu2 %v123_v23  ;;  %v101_v16 = vmul.f32 %v69_v12, %v37_v11  ;;  %v71_v17 = vld [vmem:[%s615_s1 + $0xe0] sm:$0xff]  ;;  %v70_v23 = vld [vmem:[%s615_s1 + $0xd8] sm:$0xff]  ;;  %v153_v24 = vsel %vm107_vm0, %v90_v14, 0.0  ;;  %v61_v30 = vld [vmem:[%s615_s1 + $0x90] sm:$0xff] }
  0x11   :  { %v103_v18 = vmul.f32 %v71_v17, %v39_v13  ;;  %v156_v20 = vsel %vm107_vm0, %v91_v10, 0.0  ;;  %v159_v25 = vsel %vm107_vm0, %v92_v15, 0.0  ;;  %v30_v26 = vld [vmem:[%s614_s0 + $0x98] sm:$0xff]  ;;  %v102_v29 = vmul.f32 %v70_v23, %v38_v22  ;;  %v31_v31 = vld [vmem:[%s614_s0 + $0xa0] sm:$0xff]  ;;  %v72_v36 = vld [vmem:[%s615_s1 + $0xe8] sm:$0xff] }
  0x12   :  { %v186_v19 = vsel %vm107_vm0, %v101_v16, 0.0  ;;  %v62_v27 = vld [vmem:[%s615_s1 + $0x98] sm:$0xff]  ;;  %v63_v32 = vld [vmem:[%s615_s1 + $0xa0] sm:$0xff]  ;;  %v93_v38 = vmul.f32 %v61_v30, %v29_v28  ;;  %v33_v50 = vld [vmem:[%s614_s0 + $0xb0] sm:$0xff] }
  0x13   :  { %v192_v21 = vsel %vm107_vm0, %v103_v18, 0.0  ;;  %v42_v37 = vld [vmem:[%s614_s0 + $0xf8] sm:$0xff]  ;;  %v95_v39 = vmul.f32 %v63_v32, %v31_v31  ;;  %v65_v51 = vld [vmem:[%s615_s1 + $0xb0] sm:$0xff]  ;;  %v32_v52 = vld [vmem:[%s614_s0 + $0xa8] sm:$0xff] }
  0x14   :  { %v74_v41 = vld [vmem:[%s615_s1 + $0xf8] sm:$0xff]  ;;  %v162_v48 = vsel %vm107_vm0, %v93_v38, 0.0  ;;  %v64_v54 = vld [vmem:[%s615_s1 + $0xa8] sm:$0xff]  ;;  %v97_v58 = vmul.f32 %v65_v51, %v33_v50 }
  0x15   :  { %v106_v42 = vmul.f32 %v74_v41, %v42_v37  ;;  %v168_v49 = vsel %vm107_vm0, %v95_v39, 0.0  ;;  %v34_v55 = vld [vmem:[%s614_s0 + $0xb8] sm:$0xff]  ;;  %v96_v59 = vmul.f32 %v64_v54, %v32_v52 }
  0x16   :  { %130 = vadd.xlane.f32.xlu1 %v129_v33  ;;  %127 = vadd.xlane.f32.xlu0 %v126_v34  ;;  %v189_v33 = vsel %vm107_vm0, %v102_v29, 0.0  ;;  %v94_v34 = vmul.f32 %v62_v27, %v30_v26  ;;  %v66_v56 = vld [vmem:[%s615_s1 + $0xb8] sm:$0xff]  ;;  %v174_v62 = vsel %vm107_vm0, %v97_v58, 0.0 }
  0x17   :  { %v171_v63 = vsel %vm107_vm0, %v96_v59, 0.0 }
  0x18   :  { %133 = vadd.xlane.f32.xlu2 %v132_v35  ;;  %v40_v35 = vld [vmem:[%s614_s0 + $0xe8] sm:$0xff]  ;;  %v165_v44 = vsel %vm107_vm0, %v94_v34, 0.0 }
  0x19   :  { %v104_v40 = vmul.f32 %v72_v36, %v40_v35 }
  0x1b   :  { %v195_v43 = vsel %vm107_vm0, %v104_v40, 0.0 }
  0x1e   :  { %139 = vadd.xlane.f32.xlu1 %v138_v45  ;;  %136 = vadd.xlane.f32.xlu0 %v135_v46  ;;  %v201_v45 = vsel %vm107_vm0, %v106_v42, 0.0  ;;  %v41_v46 = vld [vmem:[%s614_s0 + $0xf0] sm:$0xff] }
  0x20   :  { %142 = vadd.xlane.f32.xlu2 %v141_v47  ;;  %v73_v47 = vld [vmem:[%s615_s1 + $0xf0] sm:$0xff] }
  0x21   :  { %v105_v53 = vmul.f32 %v73_v47, %v41_v46 }
  0x23   :  { %v198_v57 = vsel %vm107_vm0, %v105_v53, 0.0 }
  0x26   :  { %148 = vadd.xlane.f32.xlu1 %v147_v60  ;;  %145 = vadd.xlane.f32.xlu0 %v144_v0  ;;  %v98_v60 = vmul.f32 %v66_v56, %v34_v55 }
  0x28   :  { %151 = vadd.xlane.f32.xlu2 %v150_v1  ;;  %v177_v0 = vsel %vm107_vm0, %v98_v60, 0.0 }
  0x2e   :  { %157 = vadd.xlane.f32.xlu1 %v156_v20  ;;  %154 = vadd.xlane.f32.xlu0 %v153_v24 }
  0x30   :  { %160 = vadd.xlane.f32.xlu2 %v159_v25 }
  0x36   :  { %166 = vadd.xlane.f32.xlu1 %v165_v44  ;;  %163 = vadd.xlane.f32.xlu0 %v162_v48 }
  0x38   :  { %169 = vadd.xlane.f32.xlu2 %v168_v49 }
  0x3e   :  { %175 = vadd.xlane.f32.xlu1 %v174_v62  ;;  %172 = vadd.xlane.f32.xlu0 %v171_v63 }
  0x40   :  { %178 = vadd.xlane.f32.xlu2 %v177_v0 }
  0x46   :  { %184 = vadd.xlane.f32.xlu1 %v366_v61  ;;  %181 = vadd.xlane.f32.xlu0 %v395_v9 }
  0x48   :  { %187 = vadd.xlane.f32.xlu2 %v186_v19 }
  0x4e   :  { %193 = vadd.xlane.f32.xlu1 %v192_v21  ;;  %190 = vadd.xlane.f32.xlu0 %v189_v33 }
  0x50   :  { %196 = vadd.xlane.f32.xlu2 %v195_v43 }
  0x56   :  { %202 = vadd.xlane.f32.xlu1 %v201_v45  ;;  %199 = vadd.xlane.f32.xlu0 %v198_v57 }
  0x79   :  { %v116_v1 = vpop.xlane.xlu1 %115  ;;  %v110_v2 = vpop.xlane.xlu0 %109 }
  0x7a   :  { %207 = vst.msk [vmem:[%s616_s2 + $0x10] sm:$0xff] %vm204_vm1, %v116_v1 }
  0x7b   :  { %v122_v3 = vpop.xlane.xlu2 %121  ;;  %205 = vst.msk [vmem:[%s616_s2] sm:$0xff] %vm204_vm1, %v110_v2 }
  0x7c   :  { %209 = vst.msk [vmem:[%s616_s2 + $0x20] sm:$0xff] %vm204_vm1, %v122_v3 }
  0x81   :  { %v119_v61 = vpop.xlane.xlu1 %118  ;;  %v113_v4 = vpop.xlane.xlu0 %112 }
  0x82   :  { %208 = vst.msk [vmem:[%s616_s2 + $0x18] sm:$0xff] %vm204_vm1, %v119_v61 }
  0x83   :  { %v125_v5 = vpop.xlane.xlu2 %124  ;;  %206 = vst.msk [vmem:[%s616_s2 + $0x8] sm:$0xff] %vm204_vm1, %v113_v4 }
  0x84   :  { %210 = vst.msk [vmem:[%s616_s2 + $0x28] sm:$0xff] %vm204_vm1, %v125_v5 }
  0x89   :  { %v131_v6 = vpop.xlane.xlu1 %130  ;;  %v128_v7 = vpop.xlane.xlu0 %127 }
  0x8a   :  { %212 = vst.msk [vmem:[%s616_s2 + $0x38] sm:$0xff] %vm204_vm1, %v131_v6 }
  0x8b   :  { %v134_v8 = vpop.xlane.xlu2 %133  ;;  %211 = vst.msk [vmem:[%s616_s2 + $0x30] sm:$0xff] %vm204_vm1, %v128_v7 }
  0x8c   :  { %213 = vst.msk [vmem:[%s616_s2 + $0x40] sm:$0xff] %vm204_vm1, %v134_v8 }
  0x91   :  { %v140_v9 = vpop.xlane.xlu1 %139  ;;  %v137_v10 = vpop.xlane.xlu0 %136 }
  0x92   :  { %215 = vst.msk [vmem:[%s616_s2 + $0x50] sm:$0xff] %vm204_vm1, %v140_v9 }
  0x93   :  { %v143_v11 = vpop.xlane.xlu2 %142  ;;  %214 = vst.msk [vmem:[%s616_s2 + $0x48] sm:$0xff] %vm204_vm1, %v137_v10 }
  0x94   :  { %216 = vst.msk [vmem:[%s616_s2 + $0x58] sm:$0xff] %vm204_vm1, %v143_v11 }
  0x99   :  { %v149_v12 = vpop.xlane.xlu1 %148  ;;  %v146_v13 = vpop.xlane.xlu0 %145 }
  0x9a   :  { %218 = vst.msk [vmem:[%s616_s2 + $0x68] sm:$0xff] %vm204_vm1, %v149_v12 }
  0x9b   :  { %v152_v14 = vpop.xlane.xlu2 %151  ;;  %217 = vst.msk [vmem:[%s616_s2 + $0x60] sm:$0xff] %vm204_vm1, %v146_v13 }
  0x9c   :  { %219 = vst.msk [vmem:[%s616_s2 + $0x70] sm:$0xff] %vm204_vm1, %v152_v14 }
  0xa1   :  { %v158_v15 = vpop.xlane.xlu1 %157  ;;  %v155_v16 = vpop.xlane.xlu0 %154 }
  0xa2   :  { %221 = vst.msk [vmem:[%s616_s2 + $0x80] sm:$0xff] %vm204_vm1, %v158_v15 }
  0xa3   :  { %v161_v17 = vpop.xlane.xlu2 %160  ;;  %220 = vst.msk [vmem:[%s616_s2 + $0x78] sm:$0xff] %vm204_vm1, %v155_v16 }
  0xa4   :  { %222 = vst.msk [vmem:[%s616_s2 + $0x88] sm:$0xff] %vm204_vm1, %v161_v17 }
  0xa9   :  { %v167_v18 = vpop.xlane.xlu1 %166  ;;  %v164_v19 = vpop.xlane.xlu0 %163 }
  0xaa   :  { %224 = vst.msk [vmem:[%s616_s2 + $0x98] sm:$0xff] %vm204_vm1, %v167_v18 }
  0xab   :  { %v170_v20 = vpop.xlane.xlu2 %169  ;;  %223 = vst.msk [vmem:[%s616_s2 + $0x90] sm:$0xff] %vm204_vm1, %v164_v19 }
  0xac   :  { %225 = vst.msk [vmem:[%s616_s2 + $0xa0] sm:$0xff] %vm204_vm1, %v170_v20 }
  0xb1   :  { %v176_v21 = vpop.xlane.xlu1 %175  ;;  %v173_v22 = vpop.xlane.xlu0 %172 }
  0xb2   :  { %227 = vst.msk [vmem:[%s616_s2 + $0xb0] sm:$0xff] %vm204_vm1, %v176_v21 }
  0xb3   :  { %v179_v23 = vpop.xlane.xlu2 %178  ;;  %226 = vst.msk [vmem:[%s616_s2 + $0xa8] sm:$0xff] %vm204_vm1, %v173_v22 }
  0xb4   :  { %228 = vst.msk [vmem:[%s616_s2 + $0xb8] sm:$0xff] %vm204_vm1, %v179_v23 }
  0xb9   :  { %v185_v24 = vpop.xlane.xlu1 %184  ;;  %v182_v25 = vpop.xlane.xlu0 %181 }
  0xba   :  { %230 = vst.msk [vmem:[%s616_s2 + $0xc8] sm:$0xff] %vm204_vm1, %v185_v24 }
  0xbb   :  { %v188_v26 = vpop.xlane.xlu2 %187  ;;  %229 = vst.msk [vmem:[%s616_s2 + $0xc0] sm:$0xff] %vm204_vm1, %v182_v25 }
  0xbc   :  { %231 = vst.msk [vmem:[%s616_s2 + $0xd0] sm:$0xff] %vm204_vm1, %v188_v26 }
  0xc1   :  { %v194_v27 = vpop.xlane.xlu1 %193  ;;  %v191_v28 = vpop.xlane.xlu0 %190 }
  0xc2   :  { %233 = vst.msk [vmem:[%s616_s2 + $0xe0] sm:$0xff] %vm204_vm1, %v194_v27 }
  0xc3   :  { %v197_v29 = vpop.xlane.xlu2 %196  ;;  %232 = vst.msk [vmem:[%s616_s2 + $0xd8] sm:$0xff] %vm204_vm1, %v191_v28 }
  0xc4   :  { %234 = vst.msk [vmem:[%s616_s2 + $0xe8] sm:$0xff] %vm204_vm1, %v197_v29 }
  0xc9   :  { %v203_v30 = vpop.xlane.xlu1 %202  ;;  %v200_v31 = vpop.xlane.xlu0 %199 }
  0xca   :  { %236 = vst.msk [vmem:[%s616_s2 + $0xf8] sm:$0xff] %vm204_vm1, %v203_v30 }
  0xcb   :  { %235 = vst.msk [vmem:[%s616_s2 + $0xf0] sm:$0xff] %vm204_vm1, %v200_v31 }

</bundles_post_ra>
